<compile_context>
chip_gen: v5e
topology: v5e:2x2
jax: 0.10.0
libtpu: 0.0.40
codegen_flags: <defaults>
</compile_context>

<pallas_src>
import jax
import jax.numpy as jnp
from jax.experimental import pallas as pl
from jax.experimental.pallas import tpu as pltpu


def _round_up(x: int, m: int) -> int:
    return ((x + m - 1) // m) * m


def _pick_batch_tile(batch: int, sublane: int, block_b: int):
    """Sublane-aligned batch tile TB and padded batch Bp.

    Targets >= 4 tiles (>= 2 per v7x TensorCore) when the batch allows it, while letting
    tiles grow up to `block_b` rows for large batches (amortizes grid-step overhead and
    fills the 256-tall MXU on v6e/v7x)."""
    bp_min = _round_up(batch, sublane)
    n_tiles = max(1, min(4, bp_min // sublane))
    tb = _round_up(-(-bp_min // n_tiles), sublane)
    tb = max(sublane, min(tb, block_b))
    return tb, _round_up(batch, tb)


def _highway_kernel(cls_ref, wp_ref, bp_ref, wc_ref, bc_ref, logits_ref, pooled_ref):
    # cls_ref:    (TB, H)   CLS-token rows, matmul dtype
    # wp_ref:     (H, H)    pooler weight, (in, out) layout -> canonical (M,K)@(K,N)
    # bp_ref:     (1, H)    pooler bias, f32
    # wc_ref:     (H, Lp)   classifier weight, (in, out) layout, lane-padded
    # bc_ref:     (1, Lp)   classifier bias, f32, lane-padded
    # logits_ref: (TB, Lp)  f32
    # pooled_ref: (TB, H)   activation dtype

    # DeiTPooler: Linear(H, H) on the CLS token + tanh (accumulate / bias / tanh in f32).
    pooled_f32 = jnp.tanh(
        jnp.dot(cls_ref[...], wp_ref[...], preferred_element_type=jnp.float32)
        + bp_ref[...]
    )
    pooled_ref[...] = pooled_f32.astype(pooled_ref.dtype)

    # TODO(synk): nn.Dropout is identity at inference; training-mode dropout not implemented.

    # classifier: Linear(H, num_labels) -> f32 logits (lane-padded columns stay zero).
    logits_ref[...] = (
        jnp.dot(pooled_f32.astype(wc_ref.dtype), wc_ref[...],
                preferred_element_type=jnp.float32)
        + bc_ref[...]
    )


def prepare_highway_params(pooler_w, pooler_b, cls_w, cls_b, *, matmul_dtype=jnp.bfloat16):
    """One-time (model-load) weight preparation.

    Transposes to (in, out) layout, casts the MXU operands, lane-pads the classifier to a
    multiple of 128.  Keep the result and reuse it for every forward -- none of this runs
    in the inference hot path."""
    # TODO(synk): num_labels == 0 (classifier = nn.Identity) path not implemented.
    h = pooler_w.shape[-1]
    l = cls_w.shape[0]
    lp = _round_up(max(l, 128), 128)
    mm = jnp.dtype(matmul_dtype)
    return {
        "wp_t": jnp.asarray(pooler_w).T.astype(mm),                                   # (H, H)
        "bp": jnp.asarray(pooler_b).astype(jnp.float32).reshape(1, h),                # (1, H)
        "wc_t": jnp.pad(jnp.asarray(cls_w).T.astype(mm), ((0, 0), (0, lp - l))),      # (H, Lp)
        "bc": jnp.pad(jnp.asarray(cls_b).astype(jnp.float32), (0, lp - l)).reshape(1, lp),
        "num_labels": l,
    }


def vit_highway_apply(hidden_states, params, *, block_b=512):
    """hidden_states: (B, S, H); params: output of prepare_highway_params.
    Returns (logits (B, num_labels) f32, pooled_output (B, H) in the activation dtype)."""
    b, _, h = hidden_states.shape
    act_dtype = hidden_states.dtype
    wp_t, bp, wc_t, bc = params["wp_t"], params["bp"], params["wc_t"], params["bc"]
    l = params["num_labels"]
    lp = wc_t.shape[1]
    mm = wp_t.dtype
    mm_bytes = jnp.dtype(mm).itemsize
    act_bytes = jnp.dtype(act_dtype).itemsize

    # Only the CLS token feeds the head; slice + cast fuse into one small HLO under jit and
    # the kernel never streams the full (B, S, H) activations.
    cls_tok = hidden_states[:, 0, :].astype(mm)

    sublane = 8 if mm_bytes >= 4 else 16
    tb, bpad = _pick_batch_tile(b, sublane, block_b)
    if bpad != b:
        cls_tok = jnp.pad(cls_tok, ((0, bpad - b), (0, 0)))

    # Working-set estimate -> explicit scoped-VMEM limit (v5e's default is only 16 MiB).
    vmem_est = (
        2 * tb * h * mm_bytes        # CLS tile (double-buffered)
        + 2 * tb * h * act_bytes     # pooled output window
        + 2 * tb * lp * 4            # logits output window (f32)
        + 2 * h * h * mm_bytes       # pooler weight (resident; 2 windows worst case)
        + 2 * h * lp * mm_bytes      # classifier weight (resident)
        + 4 * (h + lp) * 4           # biases
    )
    vmem_limit = int(min(max(2 * vmem_est, 16 << 20), 48 << 20))

    logits_p, pooled_p = pl.pallas_call(
        _highway_kernel,
        out_shape=(
            jax.ShapeDtypeStruct((bpad, lp), jnp.float32),   # logits (f32, lane-padded)
            jax.ShapeDtypeStruct((bpad, h), act_dtype),      # pooled_output
        ),
        grid=(bpad // tb,),
        in_specs=[
            pl.BlockSpec((tb, h), lambda i: (i, 0)),    # CLS rows: tiled over batch
            pl.BlockSpec((h, h), lambda i: (0, 0)),     # pooler weight (constant block index:
            pl.BlockSpec((1, h), lambda i: (0, 0)),     #   Pallas DMAs it only once)
            pl.BlockSpec((h, lp), lambda i: (0, 0)),    # classifier weight (resident)
            pl.BlockSpec((1, lp), lambda i: (0, 0)),    # classifier bias
        ],
        out_specs=(
            pl.BlockSpec((tb, lp), lambda i: (i, 0)),
            pl.BlockSpec((tb, h), lambda i: (i, 0)),
        ),
        compiler_params=pltpu.CompilerParams(
            dimension_semantics=("parallel",),          # batch tiles split across TCs (v7x)
            vmem_limit_bytes=vmem_limit,
        ),
    )(cls_tok, wp_t, bp, wc_t, bc)

    # Strip batch / label padding.
    return logits_p[:b, :l], pooled_p[:b, :]


def vit_highway(hidden_states, pooler_w, pooler_b, cls_w, cls_b, *,
                matmul_dtype=jnp.bfloat16, block_b=512):
    """Convenience wrapper (prep + apply).  Prefer calling prepare_highway_params once at
    model-load time and vit_highway_apply per step so weight prep stays off the hot path."""
    params = prepare_highway_params(pooler_w, pooler_b, cls_w, cls_b,
                                    matmul_dtype=matmul_dtype)
    return vit_highway_apply(hidden_states, params, block_b=block_b)


if __name__ == "__main__":
    # Small, DeiT-consistent shapes: batch=2, seq=8 (incl. CLS), hidden=32, num_labels=10.
    B, S, H, L = 2, 8, 32, 10
    key = jax.random.PRNGKey(0)
    k_hs, k_wp, k_bp, k_wc, k_bc = jax.random.split(key, 5)

    hidden_states = jax.random.normal(k_hs, (B, S, H), dtype=jnp.float32)
    pooler_w = jax.random.normal(k_wp, (H, H), dtype=jnp.float32) * 0.02
    pooler_b = jax.random.normal(k_bp, (H,), dtype=jnp.float32) * 0.02
    cls_w = jax.random.normal(k_wc, (L, H), dtype=jnp.float32) * 0.02
    cls_b = jax.random.normal(k_bc, (L,), dtype=jnp.float32) * 0.02

    # Reference (mirrors the PyTorch forward), f32.
    cls_tok = hidden_states[:, 0, :]
    pooled_ref = jnp.tanh(cls_tok @ pooler_w.T + pooler_b)
    logits_ref = pooled_ref @ cls_w.T + cls_b

    # Fast path: bf16 MXU operands (default), f32 accumulation -> inference-grade tolerance.
    params_bf16 = prepare_highway_params(pooler_w, pooler_b, cls_w, cls_b)   # load-time prep
    fwd_bf16 = jax.jit(lambda hs: vit_highway_apply(hs, params_bf16))
    logits, pooled = fwd_bf16(hidden_states)
    jax.block_until_ready((logits, pooled))
    assert logits.shape == (B, L) and pooled.shape == (B, H)
    assert jnp.allclose(pooled, pooled_ref, atol=2e-2, rtol=2e-2)
    assert jnp.allclose(logits, logits_ref, atol=2e-2, rtol=2e-2)

    # Exact path: f32 MXU operands, tight tolerance vs. the f32 reference.
    params_f32 = prepare_highway_params(pooler_w, pooler_b, cls_w, cls_b,
                                        matmul_dtype=jnp.float32)
    fwd_f32 = jax.jit(lambda hs: vit_highway_apply(hs, params_f32))
    logits32, pooled32 = fwd_f32(hidden_states)
    jax.block_until_ready((logits32, pooled32))
    assert jnp.allclose(pooled32, pooled_ref, atol=1e-5, rtol=1e-5)
    assert jnp.allclose(logits32, logits_ref, atol=1e-5, rtol=1e-5)

    print("KERNEL_OK")
</pallas_src>

<mosaic_0001>
module attributes {stable_mosaic.version = 11 : i64} {
  func.func @_highway_kernel(%arg0: i32, %arg1: memref<16x32xbf16, #tpu.memory_space<vmem>>, %arg2: memref<32x32xbf16, #tpu.memory_space<vmem>>, %arg3: memref<1x32xf32, #tpu.memory_space<vmem>>, %arg4: memref<32x128xbf16, #tpu.memory_space<vmem>>, %arg5: memref<1x128xf32, #tpu.memory_space<vmem>>, %arg6: memref<16x128xf32, #tpu.memory_space<vmem>>, %arg7: memref<16x32xf32, #tpu.memory_space<vmem>>) attributes {dimension_semantics = [#tpu.dimension_semantics<parallel>], iteration_bounds = array<i64: 1>, scalar_prefetch = 0 : i64, scratch_operands = 0 : i64, tpu.core_type = #tpu.core_type<tc>, window_params = [{transform_indices = @transform_0, window_bounds = array<i64: 16, 32>}, {pipeline_mode = #tpu.pipeline_mode<synchronous>, transform_indices = @transform_1, window_bounds = array<i64: 32, 32>}, {pipeline_mode = #tpu.pipeline_mode<synchronous>, transform_indices = @transform_2, window_bounds = array<i64: 1, 32>}, {pipeline_mode = #tpu.pipeline_mode<synchronous>, transform_indices = @transform_3, window_bounds = array<i64: 32, 128>}, {pipeline_mode = #tpu.pipeline_mode<synchronous>, transform_indices = @transform_4, window_bounds = array<i64: 1, 128>}, {transform_indices = @transform_5, window_bounds = array<i64: 16, 128>}, {transform_indices = @transform_6, window_bounds = array<i64: 16, 32>}]} {
    %c0 = arith.constant 0 : index
    %c0_0 = arith.constant 0 : index
    %0 = vector.load %arg1[%c0, %c0_0] : memref<16x32xbf16, #tpu.memory_space<vmem>>, vector<16x32xbf16>
    %c0_1 = arith.constant 0 : index
    %c0_2 = arith.constant 0 : index
    %1 = vector.load %arg2[%c0_1, %c0_2] : memref<32x32xbf16, #tpu.memory_space<vmem>>, vector<32x32xbf16>
    %cst = arith.constant dense<0.000000e+00> : vector<16x32xf32>
    %2 = tpu.matmul %0, %1, %cst {dimension_numbers = #tpu.dot_dimension_numbers<[1], [0], [0], [1], [0, 0, 1, 1], [], []>} : vector<16x32xbf16>, vector<32x32xbf16>, vector<16x32xf32> -> vector<16x32xf32>
    %c0_3 = arith.constant 0 : index
    %c0_4 = arith.constant 0 : index
    %3 = vector.load %arg3[%c0_3, %c0_4] : memref<1x32xf32, #tpu.memory_space<vmem>>, vector<1x32xf32>
    %4 = vector.broadcast %3 : vector<1x32xf32> to vector<16x32xf32>
    %5 = arith.addf %2, %4 : vector<16x32xf32>
    %6 = math.tanh %5 : vector<16x32xf32>
    %c0_5 = arith.constant 0 : index
    %c0_6 = arith.constant 0 : index
    %7 = vector.load %arg7[%c0_5, %c0_6] : memref<16x32xf32, #tpu.memory_space<vmem>>, vector<16x32xf32>
    tpu.vector_store %arg7[%c0_5, %c0_6], %6 {strides = array<i32>} : memref<16x32xf32, #tpu.memory_space<vmem>>, vector<16x32xf32>,
    %8 = arith.truncf %6 : vector<16x32xf32> to vector<16x32xbf16>
    %c0_7 = arith.constant 0 : index
    %c0_8 = arith.constant 0 : index
    %9 = vector.load %arg4[%c0_7, %c0_8] : memref<32x128xbf16, #tpu.memory_space<vmem>>, vector<32x128xbf16>
    %cst_9 = arith.constant dense<0.000000e+00> : vector<16x128xf32>
    %10 = tpu.matmul %8, %9, %cst_9 {dimension_numbers = #tpu.dot_dimension_numbers<[1], [0], [0], [1], [0, 0, 1, 1], [], []>} : vector<16x32xbf16>, vector<32x128xbf16>, vector<16x128xf32> -> vector<16x128xf32>
    %c0_10 = arith.constant 0 : index
    %c0_11 = arith.constant 0 : index
    %11 = vector.load %arg5[%c0_10, %c0_11] : memref<1x128xf32, #tpu.memory_space<vmem>>, vector<1x128xf32>
    %12 = vector.broadcast %11 : vector<1x128xf32> to vector<16x128xf32>
    %13 = arith.addf %10, %12 : vector<16x128xf32>
    %c0_12 = arith.constant 0 : index
    %c0_13 = arith.constant 0 : index
    %14 = vector.load %arg6[%c0_12, %c0_13] : memref<16x128xf32, #tpu.memory_space<vmem>>, vector<16x128xf32>
    tpu.vector_store %arg6[%c0_12, %c0_13], %13 {strides = array<i32>} : memref<16x128xf32, #tpu.memory_space<vmem>>, vector<16x128xf32>,
    return
  }
  func.func @transform_0(%arg0: i32) -> (i32, i32) {
    %c0_i32 = arith.constant 0 : i32
    %c0_i32_0 = arith.constant 0 : i32
    return %arg0, %c0_i32 : i32, i32
  }
  func.func @transform_1(%arg0: i32) -> (i32, i32) {
    %c0_i32 = arith.constant 0 : i32
    %c0_i32_0 = arith.constant 0 : i32
    %c0_i32_1 = arith.constant 0 : i32
    return %c0_i32, %c0_i32_0 : i32, i32
  }
  func.func @transform_2(%arg0: i32) -> (i32, i32) {
    %c0_i32 = arith.constant 0 : i32
    %c0_i32_0 = arith.constant 0 : i32
    %c0_i32_1 = arith.constant 0 : i32
    return %c0_i32, %c0_i32_0 : i32, i32
  }
  func.func @transform_3(%arg0: i32) -> (i32, i32) {
    %c0_i32 = arith.constant 0 : i32
    %c0_i32_0 = arith.constant 0 : i32
    %c0_i32_1 = arith.constant 0 : i32
    return %c0_i32, %c0_i32_0 : i32, i32
  }
  func.func @transform_4(%arg0: i32) -> (i32, i32) {
    %c0_i32 = arith.constant 0 : i32
    %c0_i32_0 = arith.constant 0 : i32
    %c0_i32_1 = arith.constant 0 : i32
    return %c0_i32, %c0_i32_0 : i32, i32
  }
  func.func @transform_5(%arg0: i32) -> (i32, i32) {
    %c0_i32 = arith.constant 0 : i32
    %c0_i32_0 = arith.constant 0 : i32
    return %arg0, %c0_i32 : i32, i32
  }
  func.func @transform_6(%arg0: i32) -> (i32, i32) {
    %c0_i32 = arith.constant 0 : i32
    %c0_i32_0 = arith.constant 0 : i32
    return %arg0, %c0_i32 : i32, i32
  }
}

</mosaic_0001>

<bundles_post_ra>
// kernel: _lambda_.1
= control target key start
LH: loop header
LB: loop body
LE: loop exit
PB: predicated region body
PF: predicated region fallthrough
CT: control target
= control target key end

     0   :  { %12 = vsyncpa [#allocation3], 0  ;;  %s199_s24 = smov [#allocation2]   ;;  %s200_s26 = smov 64   ;;  %s271_s0 = inlined_call_operand.vmem [shape: bf16[16,32], index: 0, kind: input, shape index: {}]   ;;  %s272_s1 = inlined_call_operand.hbm [shape: bf16[32,32], index: 1, kind: input, shape index: {}]   ;;  %s273_s2 = inlined_call_operand.vmem [shape: f32[1,32], index: 2, kind: input, shape index: {}]   ;;  %s274_s3 = inlined_call_operand.vmem [shape: bf16[32,128], index: 3, kind: input, shape index: {}]   ;;  %s275_s4 = inlined_call_operand.vmem [shape: f32[1,128], index: 4, kind: input, shape index: {}]   ;;  %s276_s5 = inlined_call_operand.vmem [shape: f32[16,128], index: 5, kind: output, shape index: {0}]   ;;  %s277_s6 = inlined_call_operand.vmem [shape: f32[16,32], index: 6, kind: output, shape index: {1}]  }
   0x1   :  { %s19_s23 = sshll.u32 %s272_s1, 4  ;;  %s21_s25 = sshll.u32 %s199_s24, 4  ;;  %s20_s23 = int_to_ptr.hbm [resolvable:$true] %s19_s23  ;;  %s22_s25 = int_to_ptr.vmem [resolvable:$true] %s21_s25 }
   0x2   :  { %s201_s27 = smov 4  }
   0x3   :  { %27 = dma.hbm_to_vmem [thread:$0]  %s20_s23, 256, %s22_s25, [#allocation3], %s200_s26, %s200_s26, %s201_s27  }
   0x4   :  { %197 = dma.done.wait [#allocation3], 256  }
   0x5   :  { %198 = vsyncadd [#allocation3], 4294967040  ;;  %v161_v0 = vld [vmem:[#allocation2 + $0x8] sm:$0xff]  ;;  %v160_v1 = vld [vmem:[#allocation2] sm:$0xff]  ;;  %vm66_vm0 = vcmask 261120  }
   0x6   :  { %76 = vmatpush.bf16.msra.mxu0 %v161_v0  ;;  %v159_v2 = vld [vmem:[%s271_s0] sm:$0xff]  ;;  %v163_v3 = vld [vmem:[%s274_s3 + $0x8] sm:$0xff] }
   0x7   :  { %118 = vmatpush.bf16.msra.mxu1 %v163_v3  ;;  %v162_v4 = vld [vmem:[%s274_s3] sm:$0xff] }
   0x8   :  { %v167_v5 = vld [vmem:[%s273_s2] ss:$0 sm:$0xff] }
   0x9   :  { %v168_v13 = vld [vmem:[%s275_s4] ss:$0 sm:$0xff] }
   0xa   :  { %77 = vmatpush.bf16.msra.mxu0 %v160_v1 }
   0xb   :  { %119 = vmatpush.bf16.msra.mxu1 %v162_v4 }
   0xd   :  { %149 = vmatmul.msk.bf16.vlgmr.msra.gmra.mxu0 %vm66_vm0, %v159_v2 }
  0x8a   :  { %v79_v6 = vpop.f32.mrf.mxu0 }
  0x8b   :  { %v80_v7 = vadd.f32 %v167_v5, %v79_v6 }
  0x8d   :  { %169 = vtanh.f32 %v80_v7 }
  0x92   :  { %v81_v8 = vpop.f32.mrf.mxu0 }
  0x93   :  { %v170_v9 = vpop.eup %169  ;;  %v82_v10 = vadd.f32 %v167_v5, %v81_v8 }
  0x94   :  { %86 = vst.msk [vmem:[%s277_s6] sm:$0xff] %vm66_vm0, %v170_v9 }
  0x95   :  { %171 = vtanh.f32 %v82_v10 }
  0x9b   :  { %v172_v11 = vpop.eup %171 }
  0x9c   :  { %87 = vst.msk [vmem:[%s277_s6 + $0x8] sm:$0xff] %vm66_vm0, %v172_v11  ;;  %v88_v12 = vpack.c.bf16 %v172_v11, %v170_v9 }
  0x9e   :  { %158 = vmatmul.msk.bf16.vlgmr.msra.gmra.mxu1 %vm66_vm0, %v88_v12 }
 0x11b   :  { %v121_v14 = vpop.f32.mrf.mxu1 }
 0x11c   :  { %v122_v15 = vadd.f32 %v168_v13, %v121_v14 }
 0x11e   :  { %126 = vst [vmem:[%s276_s5] sm:$0xff] %v122_v15 }
 0x123   :  { %v123_v16 = vpop.f32.mrf.mxu1 }
 0x124   :  { %v124_v17 = vadd.f32 %v168_v13, %v123_v16 }
 0x126   :  { %127 = vst [vmem:[%s276_s5 + $0x8] sm:$0xff] %v124_v17 }
 0x127   :  { %136 = vsyncpa [#allocation3], 1 }

</bundles_post_ra>
